<compile_context>
chip_gen: v7x
topology: tpu7x:2x2x1
jax: 0.10.0
libtpu: 0.0.40
codegen_flags: <defaults>
</compile_context>

<pallas_src>
import functools

import jax
import jax.numpy as jnp
import numpy as np
from jax.experimental import pallas as pl
from jax.experimental.pallas import tpu as pltpu

LANE = 128


def _round_up(v, m):
    return (v + m - 1) // m * m


# --------------------------------------------------------------------------
# Single fused kernel: im2col conv matmul + masked max-pool + bias/ReLU
#                      + folded BatchNorm + Linear/ReLU + classifier
# --------------------------------------------------------------------------
def cnn2_fused_kernel(x_ref, wcat_ref, cbias_ref, scale_ref, shift_ref,
                      w1_ref, b1_ref, w2_ref, b2_ref, out_ref,
                      *, seq_len, kernel_sizes, conv_size):
    # x_ref:     (TB, S_pad, E)        f32 (S_pad = S + max_ks - min_ks, zero padded)
    # wcat_ref:  (max_ks*E, F_pad)     bf16 merged conv weight (zero-padded per branch)
    # cbias/scale/shift: (1, F_pad)    f32
    # w1_ref:    (F_pad, H_pad) bf16   b1_ref: (1, H_pad) f32
    # w2_ref:    (H_pad, O_pad) bf16   b2_ref: (1, O_pad) f32
    # out_ref:   (TB, O_pad)           f32
    max_ks = max(kernel_sizes)
    min_ks = min(kernel_sizes)
    L = seq_len - min_ks + 1                 # positions covering every branch
    F_pad = wcat_ref.shape[1]

    x = x_ref[...]                           # (TB, S_pad, E)
    # im2col along the lane axis: patches[b, t, k*E + e] = x[b, t + k, e]
    patches = jnp.concatenate(
        [x[:, k:k + L, :] for k in range(max_ks)], axis=-1
    ).astype(jnp.bfloat16)                   # (TB, L, max_ks*E)

    # One MXU matmul for all kernel sizes / channels (bf16 in, f32 accumulate).
    conv = jnp.einsum("blk,kf->blf", patches, wcat_ref[...],
                      preferred_element_type=jnp.float32)   # (TB, L, F_pad)

    # Mask positions that are out of range for their branch (and the padding lanes).
    t_idx = jax.lax.broadcasted_iota(jnp.int32, (L, F_pad), 0)
    c_idx = jax.lax.broadcasted_iota(jnp.int32, (L, F_pad), 1)
    limit = jnp.zeros((L, F_pad), jnp.int32)
    for i, ks in enumerate(kernel_sizes):    # static, tiny -> unrolled
        grp = (c_idx >= i * conv_size) & (c_idx < (i + 1) * conv_size)
        limit = jnp.where(grp, seq_len - ks + 1, limit)
    conv = jnp.where((t_idx < limit)[None, :, :], conv, jnp.float32(-1e30))

    # Global max-pool over time; bias + ReLU hoisted past the (monotone) max:
    #   max_t relu(conv_t + b) == relu(max_t conv_t + b)
    pooled = jnp.max(conv, axis=1)                           # (TB, F_pad)
    pooled = jnp.maximum(pooled + cbias_ref[...], 0.0)

    # BatchNorm1d (eval mode) folded to scale/shift (zeros on padding lanes).
    feat = pooled * scale_ref[...] + shift_ref[...]

    # Linear + ReLU + classifier (bf16 MXU, f32 accumulate).
    h = jnp.dot(feat.astype(jnp.bfloat16), w1_ref[...],
                preferred_element_type=jnp.float32) + b1_ref[...]
    h = jnp.maximum(h, 0.0)
    out_ref[...] = jnp.dot(h.astype(jnp.bfloat16), w2_ref[...],
                           preferred_element_type=jnp.float32) + b2_ref[...]


# --------------------------------------------------------------------------
# Wrapper: pack / zero-pad parameters lane-dense and launch the fused kernel
# --------------------------------------------------------------------------
def cnn2_forward(x, params, kernel_sizes):
    B, S, E = x.shape
    C = params["conv_w"][0].shape[-1]
    F = len(kernel_sizes) * C
    H = params["lin_w"].shape[1]
    O = params["cls_w"].shape[1]

    max_ks, min_ks = max(kernel_sizes), min(kernel_sizes)
    assert S >= max_ks, "seq_len must be >= largest conv kernel size"

    F_pad = _round_up(F, LANE)
    H_pad = _round_up(H, LANE)
    O_pad = _round_up(O, LANE)
    KK = max_ks * E
    S_pad = S + (max_ks - min_ks)

    # x: pad the sequence so every branch's max_ks-wide window read is in bounds.
    x_p = jnp.pad(x, ((0, 0), (0, S_pad - S), (0, 0))).astype(jnp.float32)

    # Merged conv weight (max_ks*E, F_pad): branch i occupies columns [i*C, (i+1)*C),
    # taps k >= ks_i are zero, padding lanes are zero.
    wcat = jnp.zeros((KK, F_pad), jnp.float32)
    cbias = jnp.zeros((1, F_pad), jnp.float32)
    for i, (w, b) in enumerate(zip(params["conv_w"], params["conv_b"])):
        ks = w.shape[0]
        w_full = jnp.pad(w, ((0, max_ks - ks), (0, 0), (0, 0))).reshape(KK, C)
        wcat = wcat.at[:, i * C:(i + 1) * C].set(w_full)
        cbias = cbias.at[:, i * C:(i + 1) * C].set(b.reshape(1, C))
    wcat = wcat.astype(jnp.bfloat16)

    # BatchNorm1d (eval) folded into scale/shift; zeros on padding lanes.
    eps = 1e-5
    scale_v = params["bn_gamma"] / jnp.sqrt(params["bn_var"] + eps)
    shift_v = params["bn_beta"] - params["bn_mean"] * scale_v
    scale = jnp.zeros((1, F_pad), jnp.float32).at[0, :F].set(scale_v)
    shift = jnp.zeros((1, F_pad), jnp.float32).at[0, :F].set(shift_v)

    w1 = jnp.zeros((F_pad, H_pad), jnp.float32).at[:F, :H].set(
        params["lin_w"]).astype(jnp.bfloat16)
    b1 = jnp.zeros((1, H_pad), jnp.float32).at[:, :H].set(params["lin_b"])
    w2 = jnp.zeros((H_pad, O_pad), jnp.float32).at[:H, :O].set(
        params["cls_w"]).astype(jnp.bfloat16)
    b2 = jnp.zeros((1, O_pad), jnp.float32).at[:, :O].set(params["cls_b"])

    # TODO(synk): dropout omitted (eval-mode identity / dropout_p == 0.0 config).

    # Batch-tiled grid (grid=(1,) at demo size); batch axis is megacore-parallel.
    TB = B if B <= 64 else 64
    grid = (pl.cdiv(B, TB),)

    kern = functools.partial(cnn2_fused_kernel, seq_len=S,
                             kernel_sizes=tuple(kernel_sizes), conv_size=C)

    out_pad = pl.pallas_call(
        kern,
        out_shape=jax.ShapeDtypeStruct((B, O_pad), jnp.float32),
        grid=grid,
        in_specs=[
            pl.BlockSpec((TB, S_pad, E), lambda b: (b, 0, 0)),   # x
            pl.BlockSpec((KK, F_pad), lambda b: (0, 0)),         # merged conv weight
            pl.BlockSpec((1, F_pad), lambda b: (0, 0)),          # conv bias
            pl.BlockSpec((1, F_pad), lambda b: (0, 0)),          # BN scale
            pl.BlockSpec((1, F_pad), lambda b: (0, 0)),          # BN shift
            pl.BlockSpec((F_pad, H_pad), lambda b: (0, 0)),      # linear weight
            pl.BlockSpec((1, H_pad), lambda b: (0, 0)),          # linear bias
            pl.BlockSpec((H_pad, O_pad), lambda b: (0, 0)),      # classifier weight
            pl.BlockSpec((1, O_pad), lambda b: (0, 0)),          # classifier bias
        ],
        out_specs=pl.BlockSpec((TB, O_pad), lambda b: (b, 0)),
        compiler_params=pltpu.CompilerParams(
            dimension_semantics=("parallel",)),
    )(x_p, wcat, cbias, scale, shift, w1, b1, w2, b2)

    return out_pad[:, :O]


# --------------------------------------------------------------------------
# Pure-JAX f32 reference (faithful to the PyTorch forward) for correctness
# --------------------------------------------------------------------------
def cnn2_reference(x, params):
    pooled = []
    for w, b in zip(params["conv_w"], params["conv_b"]):
        ks, E, C = w.shape
        B, S, _ = x.shape
        L = S - ks + 1
        conv = jnp.zeros((B, L, C), jnp.float32)
        for k in range(ks):
            conv = conv + jnp.einsum("ble,ec->blc", x[:, k:k + L, :], w[k])
        conv = jax.nn.relu(conv + b.reshape(1, 1, C))
        pooled.append(jnp.max(conv, axis=1))
    cated = jnp.concatenate(pooled, axis=1)
    eps = 1e-5
    cated = (cated - params["bn_mean"]) / jnp.sqrt(params["bn_var"] + eps)
    cated = cated * params["bn_gamma"] + params["bn_beta"]
    h = jax.nn.relu(cated @ params["lin_w"] + params["lin_b"][0])
    return h @ params["cls_w"] + params["cls_b"][0]


if __name__ == "__main__":
    # Module hyper-params (small, consistent with CNN2.__init__)
    embed_size = 16
    conv_size = 8
    kernel_sizes = (2, 3)
    output_size = 4
    batch = 2
    seq_len = 8
    n_feat = len(kernel_sizes) * conv_size

    key = jax.random.PRNGKey(0)
    keys = jax.random.split(key, 16)

    params = {
        "conv_w": [jax.random.normal(keys[i], (ks, embed_size, conv_size),
                                     jnp.float32) * 0.1
                   for i, ks in enumerate(kernel_sizes)],
        "conv_b": [jax.random.normal(keys[4 + i], (1, conv_size),
                                     jnp.float32) * 0.1
                   for i in range(len(kernel_sizes))],
        "lin_w": jax.random.normal(keys[8], (n_feat, conv_size), jnp.float32) * 0.1,
        "lin_b": jax.random.normal(keys[9], (1, conv_size), jnp.float32) * 0.1,
        "cls_w": jax.random.normal(keys[10], (conv_size, output_size), jnp.float32) * 0.1,
        "cls_b": jax.random.normal(keys[11], (1, output_size), jnp.float32) * 0.1,
        # BatchNorm1d running stats / affine params (eval mode)
        "bn_gamma": jnp.ones((n_feat,), jnp.float32),
        "bn_beta": jnp.zeros((n_feat,), jnp.float32),
        "bn_mean": jnp.zeros((n_feat,), jnp.float32),
        "bn_var": jnp.ones((n_feat,), jnp.float32),
    }

    x = jax.random.normal(keys[12], (batch, seq_len, embed_size), jnp.float32)

    out = jax.block_until_ready(cnn2_forward(x, params, kernel_sizes))
    ref = jax.block_until_ready(cnn2_reference(x, params))

    # bf16 MXU inputs (f32 accumulation) => compare with a relaxed tolerance.
    np.testing.assert_allclose(np.asarray(out), np.asarray(ref),
                               rtol=2e-2, atol=2e-2)
    assert out.shape == (batch, output_size)

    print("KERNEL_OK")
</pallas_src>

<mosaic_0001>
module attributes {stable_mosaic.version = 11 : i64} {
  func.func @cnn2_fused_kernel(%arg0: i32, %arg1: memref<2x9x16xf32, #tpu.memory_space<vmem>>, %arg2: memref<48x128xbf16, #tpu.memory_space<vmem>>, %arg3: memref<1x128xf32, #tpu.memory_space<vmem>>, %arg4: memref<1x128xf32, #tpu.memory_space<vmem>>, %arg5: memref<1x128xf32, #tpu.memory_space<vmem>>, %arg6: memref<128x128xbf16, #tpu.memory_space<vmem>>, %arg7: memref<1x128xf32, #tpu.memory_space<vmem>>, %arg8: memref<128x128xbf16, #tpu.memory_space<vmem>>, %arg9: memref<1x128xf32, #tpu.memory_space<vmem>>, %arg10: memref<2x128xf32, #tpu.memory_space<vmem>>) attributes {dimension_semantics = [#tpu.dimension_semantics<parallel>], iteration_bounds = array<i64: 1>, scalar_prefetch = 0 : i64, scratch_operands = 0 : i64, tpu.core_type = #tpu.core_type<tc>, window_params = [{transform_indices = @transform_0, window_bounds = array<i64: 2, 9, 16>}, {pipeline_mode = #tpu.pipeline_mode<synchronous>, transform_indices = @transform_1, window_bounds = array<i64: 48, 128>}, {pipeline_mode = #tpu.pipeline_mode<synchronous>, transform_indices = @transform_2, window_bounds = array<i64: 1, 128>}, {pipeline_mode = #tpu.pipeline_mode<synchronous>, transform_indices = @transform_3, window_bounds = array<i64: 1, 128>}, {pipeline_mode = #tpu.pipeline_mode<synchronous>, transform_indices = @transform_4, window_bounds = array<i64: 1, 128>}, {pipeline_mode = #tpu.pipeline_mode<synchronous>, transform_indices = @transform_5, window_bounds = array<i64: 128, 128>}, {pipeline_mode = #tpu.pipeline_mode<synchronous>, transform_indices = @transform_6, window_bounds = array<i64: 1, 128>}, {pipeline_mode = #tpu.pipeline_mode<synchronous>, transform_indices = @transform_7, window_bounds = array<i64: 128, 128>}, {pipeline_mode = #tpu.pipeline_mode<synchronous>, transform_indices = @transform_8, window_bounds = array<i64: 1, 128>}, {transform_indices = @transform_9, window_bounds = array<i64: 2, 128>}]} {
    %c0 = arith.constant 0 : index
    %c0_0 = arith.constant 0 : index
    %c0_1 = arith.constant 0 : index
    %0 = vector.load %arg1[%c0, %c0_0, %c0_1] : memref<2x9x16xf32, #tpu.memory_space<vmem>>, vector<2x9x16xf32>
    %1 = vector.extract_strided_slice %0 {offsets = [0, 0, 0], sizes = [2, 7, 16], strides = [1, 1, 1]} : vector<2x9x16xf32> to vector<2x7x16xf32>
    %2 = vector.extract_strided_slice %0 {offsets = [0, 1, 0], sizes = [2, 7, 16], strides = [1, 1, 1]} : vector<2x9x16xf32> to vector<2x7x16xf32>
    %3 = vector.extract_strided_slice %0 {offsets = [0, 2, 0], sizes = [2, 7, 16], strides = [1, 1, 1]} : vector<2x9x16xf32> to vector<2x7x16xf32>
    %4 = tpu.concatenate %1, %2, %3 in 2 : vector<2x7x16xf32>, vector<2x7x16xf32>, vector<2x7x16xf32> -> vector<2x7x48xf32>
    %5 = arith.truncf %4 : vector<2x7x48xf32> to vector<2x7x48xbf16>
    %c0_2 = arith.constant 0 : index
    %c0_3 = arith.constant 0 : index
    %6 = vector.load %arg2[%c0_2, %c0_3] : memref<48x128xbf16, #tpu.memory_space<vmem>>, vector<48x128xbf16>
    "tpu.trace_start"() <{level = 10 : i32, message = "blk,kf->blf"}> : () -> ()
    %cst = arith.constant dense<0.000000e+00> : vector<2x7x128xf32>
    %7 = tpu.matmul %5, %6, %cst {dimension_numbers = #tpu.dot_dimension_numbers<[2], [0], [0, 1], [1], [0, 0, 0, 1, 1, 1], [], []>} : vector<2x7x48xbf16>, vector<48x128xbf16>, vector<2x7x128xf32> -> vector<2x7x128xf32>
    "tpu.trace_stop"() : () -> ()
    %8 = tpu.iota {dimensions = array<i32: 0>} : vector<7x128xi32>
    %9 = tpu.iota {dimensions = array<i32: 1>} : vector<7x128xi32>
    %c0_i32 = arith.constant 0 : i32
    %10 = vector.broadcast %c0_i32 : i32 to vector<7x128xi32>
    %c0_i32_4 = arith.constant 0 : i32
    %11 = vector.broadcast %c0_i32_4 : i32 to vector<7x128xi32>
    %12 = arith.cmpi sge, %9, %11 : vector<7x128xi32>
    %c8_i32 = arith.constant 8 : i32
    %13 = vector.broadcast %c8_i32 : i32 to vector<7x128xi32>
    %14 = arith.cmpi slt, %9, %13 : vector<7x128xi32>
    %15 = arith.andi %12, %14 : vector<7x128xi1>
    %c7_i32 = arith.constant 7 : i32
    %16 = vector.broadcast %c7_i32 : i32 to vector<7x128xi32>
    %17 = arith.select %15, %16, %10 : vector<7x128xi1>, vector<7x128xi32>
    %c8_i32_5 = arith.constant 8 : i32
    %18 = vector.broadcast %c8_i32_5 : i32 to vector<7x128xi32>
    %19 = arith.cmpi sge, %9, %18 : vector<7x128xi32>
    %c16_i32 = arith.constant 16 : i32
    %20 = vector.broadcast %c16_i32 : i32 to vector<7x128xi32>
    %21 = arith.cmpi slt, %9, %20 : vector<7x128xi32>
    %22 = arith.andi %19, %21 : vector<7x128xi1>
    %c6_i32 = arith.constant 6 : i32
    %23 = vector.broadcast %c6_i32 : i32 to vector<7x128xi32>
    %24 = arith.select %22, %23, %17 : vector<7x128xi1>, vector<7x128xi32>
    %25 = arith.cmpi slt, %8, %24 : vector<7x128xi32>
    %26 = vector.shape_cast %25 : vector<7x128xi1> to vector<1x7x128xi1>
    %cst_6 = arith.constant -1.000000e+30 : f32
    %27 = vector.shape_cast %26 : vector<1x7x128xi1> to vector<1x7x128xi1>
    %28 = vector.broadcast %27 : vector<1x7x128xi1> to vector<2x7x128xi1>
    %29 = vector.broadcast %cst_6 : f32 to vector<2x7x128xf32>
    %30 = arith.select %28, %7, %29 : vector<2x7x128xi1>, vector<2x7x128xf32>
    %cst_7 = arith.constant dense<0xFF800000> : vector<2x128xf32>
    %31 = vector.multi_reduction <maximumf>, %30, %cst_7 [1] : vector<2x7x128xf32> to vector<2x128xf32>
    %c0_8 = arith.constant 0 : index
    %c0_9 = arith.constant 0 : index
    %32 = vector.load %arg3[%c0_8, %c0_9] : memref<1x128xf32, #tpu.memory_space<vmem>>, vector<1x128xf32>
    %33 = vector.broadcast %32 : vector<1x128xf32> to vector<2x128xf32>
    %34 = arith.addf %31, %33 : vector<2x128xf32>
    %cst_10 = arith.constant 0.000000e+00 : f32
    %35 = vector.broadcast %cst_10 : f32 to vector<2x128xf32>
    %36 = arith.maximumf %34, %35 : vector<2x128xf32>
    %c0_11 = arith.constant 0 : index
    %c0_12 = arith.constant 0 : index
    %37 = vector.load %arg4[%c0_11, %c0_12] : memref<1x128xf32, #tpu.memory_space<vmem>>, vector<1x128xf32>
    %38 = vector.broadcast %37 : vector<1x128xf32> to vector<2x128xf32>
    %39 = arith.mulf %36, %38 : vector<2x128xf32>
    %c0_13 = arith.constant 0 : index
    %c0_14 = arith.constant 0 : index
    %40 = vector.load %arg5[%c0_13, %c0_14] : memref<1x128xf32, #tpu.memory_space<vmem>>, vector<1x128xf32>
    %41 = vector.broadcast %40 : vector<1x128xf32> to vector<2x128xf32>
    %42 = arith.addf %39, %41 : vector<2x128xf32>
    %43 = arith.truncf %42 : vector<2x128xf32> to vector<2x128xbf16>
    %c0_15 = arith.constant 0 : index
    %c0_16 = arith.constant 0 : index
    %44 = vector.load %arg6[%c0_15, %c0_16] : memref<128x128xbf16, #tpu.memory_space<vmem>>, vector<128x128xbf16>
    %cst_17 = arith.constant dense<0.000000e+00> : vector<2x128xf32>
    %45 = tpu.matmul %43, %44, %cst_17 {dimension_numbers = #tpu.dot_dimension_numbers<[1], [0], [0], [1], [0, 0, 1, 1], [], []>} : vector<2x128xbf16>, vector<128x128xbf16>, vector<2x128xf32> -> vector<2x128xf32>
    %c0_18 = arith.constant 0 : index
    %c0_19 = arith.constant 0 : index
    %46 = vector.load %arg7[%c0_18, %c0_19] : memref<1x128xf32, #tpu.memory_space<vmem>>, vector<1x128xf32>
    %47 = vector.broadcast %46 : vector<1x128xf32> to vector<2x128xf32>
    %48 = arith.addf %45, %47 : vector<2x128xf32>
    %cst_20 = arith.constant 0.000000e+00 : f32
    %49 = vector.broadcast %cst_20 : f32 to vector<2x128xf32>
    %50 = arith.maximumf %48, %49 : vector<2x128xf32>
    %51 = arith.truncf %50 : vector<2x128xf32> to vector<2x128xbf16>
    %c0_21 = arith.constant 0 : index
    %c0_22 = arith.constant 0 : index
    %52 = vector.load %arg8[%c0_21, %c0_22] : memref<128x128xbf16, #tpu.memory_space<vmem>>, vector<128x128xbf16>
    %cst_23 = arith.constant dense<0.000000e+00> : vector<2x128xf32>
    %53 = tpu.matmul %51, %52, %cst_23 {dimension_numbers = #tpu.dot_dimension_numbers<[1], [0], [0], [1], [0, 0, 1, 1], [], []>} : vector<2x128xbf16>, vector<128x128xbf16>, vector<2x128xf32> -> vector<2x128xf32>
    %c0_24 = arith.constant 0 : index
    %c0_25 = arith.constant 0 : index
    %54 = vector.load %arg9[%c0_24, %c0_25] : memref<1x128xf32, #tpu.memory_space<vmem>>, vector<1x128xf32>
    %55 = vector.broadcast %54 : vector<1x128xf32> to vector<2x128xf32>
    %56 = arith.addf %53, %55 : vector<2x128xf32>
    %c0_26 = arith.constant 0 : index
    %c0_27 = arith.constant 0 : index
    %57 = vector.load %arg10[%c0_26, %c0_27] : memref<2x128xf32, #tpu.memory_space<vmem>>, vector<2x128xf32>
    tpu.vector_store %arg10[%c0_26, %c0_27], %56 {strides = array<i32>} : memref<2x128xf32, #tpu.memory_space<vmem>>, vector<2x128xf32>,
    return
  }
  func.func @transform_0(%arg0: i32) -> (i32, i32, i32) {
    %c0_i32 = arith.constant 0 : i32
    %c0_i32_0 = arith.constant 0 : i32
    %c0_i32_1 = arith.constant 0 : i32
    return %arg0, %c0_i32, %c0_i32_0 : i32, i32, i32
  }
  func.func @transform_1(%arg0: i32) -> (i32, i32) {
    %c0_i32 = arith.constant 0 : i32
    %c0_i32_0 = arith.constant 0 : i32
    %c0_i32_1 = arith.constant 0 : i32
    return %c0_i32, %c0_i32_0 : i32, i32
  }
  func.func @transform_2(%arg0: i32) -> (i32, i32) {
    %c0_i32 = arith.constant 0 : i32
    %c0_i32_0 = arith.constant 0 : i32
    %c0_i32_1 = arith.constant 0 : i32
    return %c0_i32, %c0_i32_0 : i32, i32
  }
  func.func @transform_3(%arg0: i32) -> (i32, i32) {
    %c0_i32 = arith.constant 0 : i32
    %c0_i32_0 = arith.constant 0 : i32
    %c0_i32_1 = arith.constant 0 : i32
    return %c0_i32, %c0_i32_0 : i32, i32
  }
  func.func @transform_4(%arg0: i32) -> (i32, i32) {
    %c0_i32 = arith.constant 0 : i32
    %c0_i32_0 = arith.constant 0 : i32
    %c0_i32_1 = arith.constant 0 : i32
    return %c0_i32, %c0_i32_0 : i32, i32
  }
  func.func @transform_5(%arg0: i32) -> (i32, i32) {
    %c0_i32 = arith.constant 0 : i32
    %c0_i32_0 = arith.constant 0 : i32
    %c0_i32_1 = arith.constant 0 : i32
    return %c0_i32, %c0_i32_0 : i32, i32
  }
  func.func @transform_6(%arg0: i32) -> (i32, i32) {
    %c0_i32 = arith.constant 0 : i32
    %c0_i32_0 = arith.constant 0 : i32
    %c0_i32_1 = arith.constant 0 : i32
    return %c0_i32, %c0_i32_0 : i32, i32
  }
  func.func @transform_7(%arg0: i32) -> (i32, i32) {
    %c0_i32 = arith.constant 0 : i32
    %c0_i32_0 = arith.constant 0 : i32
    %c0_i32_1 = arith.constant 0 : i32
    return %c0_i32, %c0_i32_0 : i32, i32
  }
  func.func @transform_8(%arg0: i32) -> (i32, i32) {
    %c0_i32 = arith.constant 0 : i32
    %c0_i32_0 = arith.constant 0 : i32
    %c0_i32_1 = arith.constant 0 : i32
    return %c0_i32, %c0_i32_0 : i32, i32
  }
  func.func @transform_9(%arg0: i32) -> (i32, i32) {
    %c0_i32 = arith.constant 0 : i32
    %c0_i32_0 = arith.constant 0 : i32
    return %arg0, %c0_i32 : i32, i32
  }
}

</mosaic_0001>

<bundles_post_ra>
// kernel: tpu_custom_call.1
= control target key start
LH: loop header
LB: loop body
LE: loop exit
PB: predicated region body
PF: predicated region fallthrough
CT: control target
= control target key end

     0   :  { %14 = vsyncpa [#allocation3], 0  ;;  %s1235_s0 = inlined_call_operand.vmem [shape: f32[2,9,16], index: 0, kind: input, shape index: {}]   ;;  %s1236_s1 = inlined_call_operand.hbm [shape: bf16[48,128], index: 1, kind: input, shape index: {}]   ;;  %s1237_s2 = inlined_call_operand.vmem [shape: f32[1,128], index: 2, kind: input, shape index: {}]   ;;  %s1238_s3 = inlined_call_operand.vmem [shape: f32[1,128], index: 3, kind: input, shape index: {}]   ;;  %s1239_s4 = inlined_call_operand.vmem [shape: f32[1,128], index: 4, kind: input, shape index: {}]   ;;  %s1240_s5 = inlined_call_operand.vmem [shape: bf16[128,128], index: 5, kind: input, shape index: {}]   ;;  %s1241_s6 = inlined_call_operand.vmem [shape: f32[1,128], index: 6, kind: input, shape index: {}]   ;;  %s1242_s7 = inlined_call_operand.hbm [shape: bf16[128,128], index: 7, kind: input, shape index: {}]   ;;  %s1243_s8 = inlined_call_operand.vmem [shape: f32[1,128], index: 8, kind: input, shape index: {}]   ;;  %s1244_s9 = inlined_call_operand.hbm [shape: f32[2,128], index: 9, kind: output, shape index: {}]  }
   0x1   :  { %15 = vsyncpa [#allocation6], 0 }
   0x2   :  { %16 = vsyncpa [#allocation4], 0  ;;  %s1010_s30 = smov [#allocation2]   ;;  %s938_s13 = scalar_lea.hbm %s1236_s1, 384 }
   0x3   :  { %s24_s10 = sshll.u32 %s1010_s30, 4  ;;  %p939_p0 = scmp.ne.s32.totalorder %s1236_s1, %s938_s13  ;;  %s25_s10 = int_to_ptr.vmem [resolvable:$true] %s24_s10 }
   0x4   :  { %p942_p1 = scmp.lt.u32.totalorder %s938_s13, %s1236_s1 }
   0x6   :  { %p944_p2 = pnand %p942_p1, %p939_p0 }
   0x8   :  { %947 = shalt.err (!%p944_p2)
}
   0x9   :  { %s948_s18 = scalar_lea.vmem %s25_s10, 384  ;;  %p953_p4 = scmp.lt.s32.totalorder %s25_s10, %s25_s10 }
   0xa   :  { %p949_p3 = scmp.ne.s32.totalorder %s25_s10, %s948_s18  ;;  %p954_p5 = scmp.lt.s32.totalorder %s948_s18, %s948_s18 }
   0xc   :  { %p955_p6 = por %p954_p5, %p953_p4 }
   0xe   :  { %p956_p7 = pnand %p955_p6, %p949_p3 }
  0x10   :  { %959 = shalt.err (!%p956_p7)
}
  0x11   :  { %s1011_s19 = smov 64   ;;  %s1012_s20 = smov 4  }
  0x12   :  { %30 = dma.hbm_to_vmem [thread:$0]  %s1236_s1, 384, %s25_s10, [#allocation3], %s1011_s19, %s1011_s19, %s1012_s20  }
  0x13   :  { %s1013_s23 = smov [#allocation5]   ;;  %s960_s27 = scalar_lea.hbm %s1242_s7, 1024 }
  0x14   :  { %s46_s24 = sshll.u32 %s1013_s23, 4  ;;  %p961_p8 = scmp.ne.s32.totalorder %s1242_s7, %s960_s27  ;;  %s47_s24 = int_to_ptr.vmem [resolvable:$true] %s46_s24 }
  0x15   :  { %p964_p9 = scmp.lt.u32.totalorder %s960_s27, %s1242_s7 }
  0x17   :  { %p966_p10 = pnand %p964_p9, %p961_p8 }
  0x19   :  { %969 = shalt.err (!%p966_p10)
}
  0x1a   :  { %s970_s12 = scalar_lea.vmem %s47_s24, 1024  ;;  %p975_p12 = scmp.lt.s32.totalorder %s47_s24, %s47_s24 }
  0x1b   :  { %p971_p11 = scmp.ne.s32.totalorder %s47_s24, %s970_s12  ;;  %p976_p13 = scmp.lt.s32.totalorder %s970_s12, %s970_s12 }
  0x1d   :  { %p977_p0 = por %p976_p13, %p975_p12 }
  0x1f   :  { %p978_p1 = pnand %p977_p0, %p971_p11 }
  0x21   :  { %981 = shalt.err (!%p978_p1)
}
  0x22   :  { %52 = dma.hbm_to_vmem [thread:$0]  %s1242_s7, 1024, %s47_s24, [#allocation6], %s1011_s19, %s1011_s19, %s1012_s20  }
  0x23   :  { %1004 = dma.done.wait [#allocation3], 384  }
  0x24   :  { %1005 = vsyncadd [#allocation3], 4294966912 }
  0x25   :  { %1006 = dma.done.wait [#allocation6], 1024  }
  0x26   :  { %1007 = vsyncadd [#allocation6], 4294966272  ;;  %v62_v0 = vld [vmem:[%s1235_s0] sm:$0xff]  ;;  %v64_v1 = vld [vmem:[%s1235_s0 + $0x10] sm:$0xff]  ;;  %vm78_vm0 = vcmask 1045504   ;;  %s1014_s20 = smov 16   ;;  %v110_v20 = vlaneseq }
  0x27   :  { %v63_v2 = vld [vmem:[%s1235_s0 + $0x8] sm:$0x1]  ;;  %v68_v3 = vrot.slane %v62_v0, 1  ;;  %v69_v4 = vrot.slane %v64_v1, 1  ;;  %v79_v5 = vrot.slane %v62_v0, 2  ;;  %v82_v6 = vrot.slane %v64_v1, 2 }
  0x28   :  { %v65_v7 = vld [vmem:[%s1235_s0 + $0x18] sm:$0x1]  ;;  %v80_v8 = vrot.slane %v63_v2, 2  ;;  %s1015_s21 = smov 32   ;;  %v919_v14 = vld [vmem:[#allocation2] sm:$0xff]   ;;  %v1016_v15 = vmov 0.0  }
  0x29   :  { %v83_v9 = vrot.slane %v65_v7, 2  ;;  %v909_v10 = vpack.i.bf16 %v69_v4, %v68_v3  ;;  %848 = vmatprep.subr.bf16.mxu0 %v1016_v15  ;;  %858 = vmatprep.subr.bf16.mxu1 %v1016_v15  ;;  %v920_v16 = vld [vmem:[#allocation2 + $0x8] sm:$0xff]   ;;  %vm1017_vm1 = vmmov 0   ;;  %v921_v17 = vld [vmem:[#allocation2 + $0x10] sm:$0xff]   ;;  %v1018_v18 = vmov 1966171168  }
  0x2a   :  { %v81_v11 = vsel %vm78_vm0, %v79_v5, %v80_v8  ;;  %849 = vmatpush3.bf16.msra.mxu0 %v919_v14  ;;  %854 = vmatprep.mubr.msk.bf16.mxu0 %vm1017_vm1, %v1016_v15  ;;  %v108_v19 = vunpack.c.l.s4 %v1018_v18  ;;  %v1117_v25 = vshrl.u32 %v110_v20, 7  ;;  %vm91_vm2 = vcmask 130048   ;;  %v922_v3 = vld [vmem:[%s1240_s5] sm:$0xff]   ;;  %v923_v4 = vld [vmem:[%s1240_s5 + $0x8] sm:$0xff]   ;;  %v924_v5 = vld [vmem:[%s1240_s5 + $0x10] sm:$0xff]  }
  0x2b   :  { %v84_v12 = vsel %vm78_vm0, %v82_v6, %v83_v9  ;;  %910 = vrot.lane.b32.xlu0 %v909_v10, %s1014_s20  ;;  %850 = vmatprep.subr.bf16.mxu0 %v1016_v15  ;;  %vm94_vm3 = vcmask 261120   ;;  %vm242_vm4 = vcmask 392192   ;;  %v925_v6 = vld [vmem:[%s1240_s5 + $0x18] sm:$0xff]   ;;  %v926_v7 = vld [vmem:[%s1240_s5 + $0x20] sm:$0xff]   ;;  %v927_v8 = vld [vmem:[%s1240_s5 + $0x28] sm:$0xff]   ;;  %vm500_vm10 = vcmask 1046528  }
  0x2c   :  { %v914_v13 = vpack.i.bf16 %v84_v12, %v81_v11  ;;  %874 = vmatprep.mubr.msk.bf16.mxu1 %vm1017_vm1, %v1016_v15  ;;  %v109_v24 = vunpack.c.0.s8 %v108_v19  ;;  %859 = vmatpush3.bf16.msra.mxu1 %v922_v3  ;;  %v928_v9 = vld [vmem:[%s1240_s5 + $0x30] sm:$0xff]   ;;  %v929_v10 = vld [vmem:[%s1240_s5 + $0x38] sm:$0xff]   ;;  %v931_v12 = vld [vmem:[#allocation5 + $0x8] sm:$0xff]   ;;  %v388_v19 = vand.u32 127, %v110_v20  ;;  %vm574_vm11 = vcmask 1041409   ;;  %s1020_s20 = smov [#allocation7]  }
  0x2d   :  { %860 = vmatprep.subr.bf16.mxu1 %v1016_v15  ;;  %v930_v11 = vld [vmem:[#allocation5] sm:$0xff]   ;;  %v933_v14 = vld [vmem:[#allocation5 + $0x18] sm:$0xff]  }
  0x2e   :  { %851 = vmatpush3.bf16.msra.mxu0 %v920_v16  ;;  %v1120_v31 = vsub.s32 %v109_v24, %v1117_v25  ;;  %v934_v16 = vld [vmem:[#allocation5 + $0x20] sm:$0xff]   ;;  %vm390_vm5 = vcmp.lt.s32.totalorder %v388_v19, 8  ;;  %vm393_vm6 = vcmp.ge.s32.totalorder %v388_v19, 8  ;;  %vm394_vm7 = vcmp.lt.s32.totalorder %v388_v19, 16 }
  0x2f   :  { %915 = vrot.lane.b32.xlu0 %v914_v13, %s1015_s21  ;;  %852 = vmatprep.subr.bf16.mxu0 %v1016_v15  ;;  %v932_v13 = vld [vmem:[#allocation5 + $0x10] sm:$0xff]   ;;  %vm1189_vm8 = vmand %vm393_vm6, %vm394_vm7  ;;  %s786_s21 = sshll.u32 %s1020_s20, 4  ;;  %s787_s21 = int_to_ptr.vmem [resolvable:$true] %s786_s21 }
  0x30   :  { %861 = vmatpush3.bf16.msra.mxu1 %v923_v4  ;;  %p987_p3 = scmp.lt.s32.totalorder %s787_s21, %s787_s21 }
  0x31   :  { %862 = vmatprep.subr.bf16.mxu1 %v1016_v15 }
  0x32   :  { %853 = vmatpush3.bf16.msra.mxu0 %v921_v17  ;;  %v935_v17 = vld [vmem:[#allocation5 + $0x28] sm:$0xff]  }
  0x33   :  { %878 = vmatprep.subr.bf16.mxu0 %v1016_v15 }
  0x34   :  { %863 = vmatpush3.bf16.msra.mxu1 %v924_v5 }
  0x35   :  { %864 = vmatprep.subr.bf16.mxu1 %v1016_v15 }
  0x38   :  { %865 = vmatpush3.bf16.msra.mxu1 %v925_v6 }
  0x39   :  { %866 = vmatprep.subr.bf16.mxu1 %v1016_v15 }
  0x3c   :  { %867 = vmatpush3.bf16.msra.mxu1 %v926_v7 }
  0x3d   :  { %868 = vmatprep.subr.bf16.mxu1 %v1016_v15 }
  0x40   :  { %869 = vmatpush3.bf16.msra.mxu1 %v927_v8 }
  0x41   :  { %870 = vmatprep.subr.bf16.mxu1 %v1016_v15 }
  0x44   :  { %871 = vmatpush3.bf16.msra.mxu1 %v928_v9 }
  0x45   :  { %872 = vmatprep.subr.bf16.mxu1 %v1016_v15 }
  0x48   :  { %873 = vmatpush3.bf16.msra.mxu1 %v929_v10 }
  0x9d   :  { %v911_v21 = vpop.permute.xlu0 %910 }
  0x9e   :  { %v913_v22 = vunpack.i.h.bf16 %v911_v21  ;;  %v912_v23 = vunpack.i.l.bf16 %v911_v21 }
  0xa0   :  { %v93_v29 = vsel %vm91_vm2, %v64_v1, %v913_v22  ;;  %v92_v30 = vsel %vm91_vm2, %v62_v0, %v912_v23 }
  0xa1   :  { %v916_v26 = vpop.permute.xlu0 %915 }
  0xa2   :  { %v918_v27 = vunpack.i.h.bf16 %v916_v26  ;;  %v917_v28 = vunpack.i.l.bf16 %v916_v26 }
  0xa4   :  { %v95_v32 = vsel %vm94_vm3, %v92_v30, %v917_v28  ;;  %v96_v33 = vsel %vm94_vm3, %v93_v29, %v918_v27 }
  0xa5   :  { %v97_v34 = vpack.c.bf16 %v95_v32, %v95_v32  ;;  %v98_v35 = vpack.c.bf16 %v96_v33, %v96_v33 }
  0xa7   :  { %v113_v36 = vrot.slane %v97_v34, %v1120_v31  ;;  %v137_v37 = vrot.slane %v98_v35, %v1120_v31 }
  0xa9   :  { %v114_v38 = vcombine.high %v113_v36, %v113_v36  ;;  %v138_v39 = vcombine.high %v137_v37, %v137_v37  ;;  %v145_v40 = vrot.slane %v137_v37, %v1120_v31  ;;  %v121_v41 = vrot.slane %v113_v36, %v1120_v31 }
  0xab   :  { %v128_v42 = vrot.slane %v114_v38, %v1120_v31  ;;  %v152_v43 = vrot.slane %v138_v39, %v1120_v31  ;;  %v153_v44 = vcombine.high %v145_v40, %v145_v40  ;;  %v163_v45 = vunpack.i.h.s16 %v145_v40 }
  0xac   :  { %v129_v50 = vcombine.high %v121_v41, %v121_v41 }
  0xad   :  { %v130_v46 = vcombine.high %v128_v42, %v128_v42  ;;  %v154_v47 = vcombine.high %v152_v43, %v152_v43  ;;  %v165_v48 = vunpack.i.h.s16 %v152_v43  ;;  %v167_v49 = vunpack.i.h.s16 %v153_v44 }
  0xae   :  { %v797_v51 = vpack.i.b16 %v152_v43, %v163_v45  ;;  %v176_v54 = vcombine.low %v121_v41, %v128_v42  ;;  %v1019_v42 = vmov 0  }
  0xaf   :  { %v796_v52 = vpack.i.b16 %v145_v40, %v130_v46  ;;  %v798_v53 = vpack.i.b16 %v153_v44, %v165_v48  ;;  %v799_v55 = vpack.i.b16 %v154_v47, %v167_v49  ;;  %v392_v43 = vsel %vm390_vm5, 7, %v1019_v42 }
  0xb0   :  { %v185_v58 = vrot.slane %v176_v54, %v1120_v31 }
  0xb1   :  { %v177_v56 = vcombine.low %v129_v50, %v796_v52  ;;  %v178_v57 = vcombine.low %v797_v51, %v798_v53  ;;  %v206_v61 = vrot.slane %v799_v55, %v1120_v31 }
  0xb3   :  { %v192_v59 = vrot.slane %v177_v56, %v1120_v31  ;;  %v199_v60 = vrot.slane %v178_v57, %v1120_v31 }
  0xb5   :  { %v207_v62 = vcombine.low %v185_v58, %v192_v59  ;;  %v208_v63 = vcombine.low %v199_v60, %v206_v61  ;;  %v396_v61 = vsel %vm1189_vm8, 6, %v392_v43 }
  0xb6   :  { %vm397_vm9 = vcmp.lt.s32.totalorder %v1117_v25, %v396_v61 }
  0xb7   :  { %v215_v0 = vrot.slane %v207_v62, %v1120_v31  ;;  %v222_v1 = vrot.slane %v208_v63, %v1120_v31 }
  0xb9   :  { %v223_v2 = vcombine.low %v215_v0, %v222_v1 }
  0xbb   :  { %855 = vmatmul.mubr.msk.bf16.vlgmr.msra.gmra.mrb[0].mxu0 %vm242_vm4, %v223_v2 }
  0xbc   :  { %894 = vmatprep.mubr.msk.bf16.mxu0 %vm1017_vm1, %v1016_v15  ;;  %879 = vmatpush3.bf16.msra.mxu0 %v930_v11 }
  0xbd   :  { %880 = vmatprep.subr.bf16.mxu0 %v1016_v15 }
  0xc0   :  { %881 = vmatpush3.bf16.msra.mxu0 %v931_v12 }
  0xc1   :  { %882 = vmatprep.subr.bf16.mxu0 %v1016_v15 }
  0xc4   :  { %883 = vmatpush3.bf16.msra.mxu0 %v932_v13 }
  0xc5   :  { %884 = vmatprep.subr.bf16.mxu0 %v1016_v15 }
  0xc8   :  { %885 = vmatpush3.bf16.msra.mxu0 %v933_v14 }
  0xc9   :  { %886 = vmatprep.subr.bf16.mxu0 %v1016_v15 }
  0xcc   :  { %887 = vmatpush3.bf16.msra.mxu0 %v934_v16 }
  0xcd   :  { %888 = vmatprep.subr.bf16.mxu0 %v1016_v15 }
  0xd0   :  { %889 = vmatpush3.bf16.msra.mxu0 %v935_v17 }
  0xd1   :  { %890 = vmatprep.subr.bf16.mxu0 %v1016_v15 }
 0x18e   :  { %v280_v18 = vpop.f32.mrb[0].mxu0 }
 0x18f   :  { %v289_v21 = vcombine.high %v280_v18, %v280_v18  ;;  %v296_v22 = vrot.slane %v280_v18, %v1120_v31  ;;  %v856_v23 = vpop.f32.mrb[1].mxu0 }
 0x190   :  { %v283_v24 = vpop.f32.mrb[2].mxu0 }
 0x191   :  { %v303_v26 = vrot.slane %v289_v21, %v1120_v31  ;;  %v304_v27 = vcombine.high %v296_v22, %v296_v22  ;;  %v338_v28 = vcombine.high %v283_v24, %v283_v24  ;;  %v857_v29 = vpop.f32.mrb[3].mxu0  ;;  %v312_v30 = vrot.slane %v296_v22, %v1120_v31 }
 0x192   :  { %v345_v32 = vrot.slane %v283_v24, %v1120_v31 }
 0x193   :  { %v305_v33 = vcombine.high %v303_v26, %v303_v26  ;;  %v319_v34 = vrot.slane %v303_v26, %v1120_v31  ;;  %v326_v20 = vrot.slane %v304_v27, %v1120_v31  ;;  %v352_v35 = vrot.slane %v338_v28, %v1120_v31  ;;  %v805_v26 = vld [vmem:[%s1237_s2] ss:$0 sm:$0xff] }
 0x194   :  { %v353_v36 = vcombine.high %v345_v32, %v345_v32  ;;  %v361_v37 = vrot.slane %v345_v32, %v1120_v31 }
 0x195   :  { %v333_v38 = vrot.slane %v305_v33, %v1120_v31  ;;  %v335_v39 = vcombine.high %v319_v34, %v319_v34  ;;  %v400_v40 = vcombine.low %v312_v30, %v326_v20  ;;  %v804_v41 = vcombine.high %v312_v30, %v326_v20  ;;  %v806_v30 = vld [vmem:[%s1238_s3] ss:$0 sm:$0xff] }
 0x196   :  { %v354_v44 = vcombine.high %v352_v35, %v352_v35  ;;  %v375_v45 = vrot.slane %v353_v36, %v1120_v31  ;;  %v383_v46 = vcombine.high %v361_v37, %v361_v37  ;;  %v368_v50 = vrot.slane %v352_v35, %v1120_v31  ;;  %v807_v20 = vld [vmem:[%s1239_s4] ss:$0 sm:$0xff] }
 0x197   :  { %v402_v47 = vcombine.low %v319_v34, %v333_v38  ;;  %v409_v48 = vrot.slane %v400_v40, %v1120_v31  ;;  %v416_v49 = vrot.slane %v804_v41, %v1120_v31  ;;  %v337_v52 = vcombine.high %v333_v38, %v333_v38 }
 0x198   :  { %v382_v53 = vrot.slane %v354_v44, %v1120_v31  ;;  %v384_v54 = vcombine.high %v375_v45, %v375_v45  ;;  %v449_v55 = vcombine.low %v375_v45, %v383_v46  ;;  %v430_v57 = vrot.slane %v335_v39, %v1120_v31  ;;  %v936_v46 = vld [vmem:[#allocation5 + $0x30] sm:$0xff]  }
 0x199   :  { %v423_v56 = vrot.slane %v402_v47, %v1120_v31  ;;  %v431_v58 = vcombine.low %v409_v48, %v416_v49  ;;  %v448_v59 = vcombine.low %v337_v52, %v361_v37  ;;  %891 = vmatpush3.bf16.msra.mxu0 %v936_v46  ;;  %v937_v47 = vld [vmem:[#allocation5 + $0x38] sm:$0xff]   ;;  %v808_v48 = vld [vmem:[%s1241_s6] ss:$0 sm:$0xff]  ;;  %s982_s6 = scalar_lea.vmem %s787_s21, 32 }
 0x19a   :  { %v450_v60 = vcombine.low %v384_v54, %v368_v50  ;;  %v464_v0 = vrot.slane %v449_v55, %v1120_v31  ;;  %v478_v2 = vrot.slane %v382_v53, %v1120_v31  ;;  %892 = vmatprep.subr.bf16.mxu0 %v1016_v15  ;;  %p983_p2 = scmp.ne.s32.totalorder %s787_s21, %s982_s6  ;;  %p988_p4 = scmp.lt.s32.totalorder %s982_s6, %s982_s6 }
 0x19b   :  { %v432_v62 = vcombine.low %v423_v56, %v430_v57  ;;  %v457_v63 = vrot.slane %v448_v59, %v1120_v31  ;;  %v439_v3 = vrot.slane %v431_v58, %v1120_v31  ;;  %v817_v56 = vld [vmem:[%s1243_s8] ss:$0 sm:$0xff] }
 0x19c   :  { %v471_v1 = vrot.slane %v450_v60, %v1120_v31  ;;  %p989_p5 = por %p988_p4, %p987_p3 }
 0x19d   :  { %v446_v4 = vrot.slane %v432_v62, %v1120_v31  ;;  %v479_v5 = vcombine.low %v457_v63, %v464_v0  ;;  %893 = vmatpush3.bf16.msra.mxu0 %v937_v47 }
 0x19e   :  { %v480_v6 = vcombine.low %v471_v1, %v478_v2  ;;  %p990_p6 = pnand %p989_p5, %p983_p2 }
 0x19f   :  { %v447_v7 = vcombine.low %v439_v3, %v446_v4  ;;  %v487_v8 = vrot.slane %v479_v5, %v1120_v31 }
 0x1a0   :  { %v494_v9 = vrot.slane %v480_v6, %v1120_v31 }
 0x1a1   :  { %v498_v10 = vsel %vm397_vm9, %v447_v7, -1e+30 }
 0x1a2   :  { %v501_v11 = vsel %vm500_vm10, %v498_v10, -inf  ;;  %v495_v12 = vcombine.low %v487_v8, %v494_v9 }
 0x1a3   :  { %v502_v13 = vrot.slane %v501_v11, 4 }
 0x1a4   :  { %v499_v14 = vsel %vm397_vm9, %v495_v12, -1e+30 }
 0x1a5   :  { %v503_v16 = vmax.f32 %v501_v11, %v502_v13  ;;  %v508_v17 = vsel %vm500_vm10, %v499_v14, -inf }
 0x1a6   :  { %v509_v18 = vrot.slane %v508_v17, 4 }
 0x1a7   :  { %v504_v19 = vrot.slane %v503_v16, 2 }
 0x1a8   :  { %v510_v21 = vmax.f32 %v508_v17, %v509_v18 }
 0x1a9   :  { %v505_v22 = vmax.f32 %v503_v16, %v504_v19 }
 0x1aa   :  { %v511_v25 = vrot.slane %v510_v21, 2 }
 0x1ab   :  { %v506_v23 = vrot.slane %v505_v22, 1 }
 0x1ac   :  { %v512_v24 = vmax.f32 %v510_v21, %v511_v25 }
 0x1ad   :  { %v507_v27 = vmax.f32 %v505_v22, %v506_v23 }
 0x1ae   :  { %v513_v31 = vrot.slane %v512_v24, 1 }
 0x1af   :  { %v522_v28 = vadd.f32 %v805_v26, %v507_v27 }
 0x1b0   :  { %v514_v29 = vmax.f32 %v512_v24, %v513_v31 }
 0x1b1   :  { %v524_v32 = vmax.f32 %v522_v28, 0.0 }
 0x1b2   :  { %v523_v33 = vadd.f32 %v805_v26, %v514_v29 }
 0x1b3   :  { %v533_v34 = vmul.f32 %v806_v30, %v524_v32 }
 0x1b4   :  { %v525_v35 = vmax.f32 %v523_v33, 0.0 }
 0x1b5   :  { %v542_v37 = vadd.f32 %v807_v20, %v533_v34 }
 0x1b6   :  { %v534_v36 = vmul.f32 %v806_v30, %v525_v35 }
 0x1b7   :  { %v544_v39 = vpack.c.bf16 %v542_v37, %v542_v37 }
 0x1b8   :  { %v543_v38 = vadd.f32 %v807_v20, %v534_v36 }
 0x1b9   :  { %v571_v42 = vunpack.c.l.b16 %v544_v39 }
 0x1ba   :  { %v545_v40 = vpack.c.bf16 %v543_v38, %v543_v38 }
 0x1bc   :  { %v572_v41 = vunpack.c.l.b16 %v545_v40 }
 0x1be   :  { %v573_v43 = vrot.slane %v572_v41, 7 }
 0x1c0   :  { %v575_v44 = vsel %vm574_vm11, %v573_v43, %v571_v42 }
 0x1c1   :  { %v576_v45 = vpack.c.b16 %v575_v44, %v575_v44 }
 0x1c3   :  { %875 = vmatmul.mubr.bf16.vlgmr.msra.gmra.mrb[0].mxu1 %v576_v45 }
 0x296   :  { %v660_v49 = vpop.f32.mrb[0].mxu1 }
 0x297   :  { %v661_v50 = vadd.f32 %v808_v48, %v660_v49  ;;  %v876_v51 = vpop.f32.mrb[1].mxu1 }
 0x298   :  { %v663_v52 = vpop.f32.mrb[2].mxu1 }
 0x299   :  { %v666_v53 = vmax.f32 %v661_v50, 0.0  ;;  %v877_v54 = vpop.f32.mrb[3].mxu1 }
 0x29b   :  { %v667_v55 = vpack.c.bf16 %v666_v53, %v666_v53 }
 0x29d   :  { %895 = vmatmul.mubr.bf16.vlgmr.msra.gmra.mrb[4].mxu0 %v667_v55 }
 0x370   :  { %v773_v15 = vpop.f32.mrb[4].mxu0 }
 0x371   :  { %v774_v57 = vadd.f32 %v817_v56, %v773_v15  ;;  %v896_v58 = vpop.f32.mrb[5].mxu0 }
 0x372   :  { %v776_v59 = vpop.f32.mrb[6].mxu0 }
 0x373   :  { %779 = vst [vmem:[#allocation7] sm:$0x3] %v774_v57  ;;  %v897_v60 = vpop.f32.mrb[7].mxu0 }
 0x374   :  { %993 = shalt.err (!%p990_p6)
}
 0x375   :  { %s994_s8 = scalar_lea.hbm %s1244_s9, 32 }
 0x376   :  { %p995_p7 = scmp.ne.s32.totalorder %s1244_s9, %s994_s8  ;;  %p998_p8 = scmp.lt.u32.totalorder %s994_s8, %s1244_s9 }
 0x378   :  { %p1000_p9 = pnand %p998_p8, %p995_p7 }
 0x37a   :  { %1003 = shalt.err (!%p1000_p9)
}
 0x37b   :  { %789 = dma.vmem_to_hbm [thread:$0]  %s787_s21, 32, %s1244_s9, [#allocation4]  }
 0x37c   :  { %1008 = dma.done.wait [#allocation4], 32  }
 0x37d   :  { %1009 = vsyncadd [#allocation4], 4294967264 }
 0x37e   :  { %793 = vsyncpa [#allocation3], 1 }
 0x37f   :  { %794 = vsyncpa [#allocation6], 1 }
 0x380   :  { %795 = vsyncpa [#allocation4], 1 }

</bundles_post_ra>
